<compile_context>
chip_gen: v7x
topology: tpu7x:2x2x1
jax: 0.10.0
libtpu: 0.0.40
codegen_flags: <defaults>
</compile_context>

<pallas_src>
import jax
import jax.numpy as jnp
from jax.experimental import pallas as pl
from jax.experimental.pallas import tpu as pltpu


def _round_up(n, m):
    return ((n + m - 1) // m) * m


# -----------------------------------------------------------------------------
# Kernel
# -----------------------------------------------------------------------------
def _encoder_kernel(x_ref,
                    w1_ref, b1_ref,
                    w2_ref, b2_ref,
                    wh_ref, bh_ref,
                    out_ref):
    """One batch tile of the fused 3-stage MLP.

    x_ref  : (TB, input_dim)                       f32
    w1/b1  : (input_dim, 64) / (1, 64)             w: compute dtype, b: f32
    w2/b2  : (64, 32)        / (1, 32)
    wh/bh  : (32, 2*latent)  / (1, 2*latent)       fused [mu | logvar] head
    out_ref: (TB, 2*latent)                        f32, unpadded (no HBM write amp)
    """
    cdt = w1_ref.dtype  # MXU operand dtype (f32 exact path, or bf16 fast path)
    x = x_ref[...]

    # fc[0]: Linear(input_dim, 64) + ReLU
    h = jnp.dot(x.astype(cdt), w1_ref[...],
                preferred_element_type=jnp.float32) + b1_ref[...]
    h = jnp.maximum(h, 0.0)

    # fc[2]: Linear(64, 32) + ReLU
    h = jnp.dot(h.astype(cdt), w2_ref[...],
                preferred_element_type=jnp.float32) + b2_ref[...]
    h = jnp.maximum(h, 0.0)

    # Fused mu/logvar heads: single MXU push, single contiguous store.
    out = jnp.dot(h.astype(cdt), wh_ref[...],
                  preferred_element_type=jnp.float32) + bh_ref[...]
    out_ref[...] = out.astype(out_ref.dtype)


# -----------------------------------------------------------------------------
# Parameter fusion (done ONCE, not per forward call)
# -----------------------------------------------------------------------------
def fuse_encoder_params(params, *, compute_dtype=jnp.float32):
    """Concatenate the mu/logvar heads column-wise and (optionally) cast the
    weight matrices to the MXU compute dtype.  Biases stay f32 (added post-dot)."""
    (w1, b1), (w2, b2), (wmu, bmu), (wlv, blv) = params
    cdt = jnp.dtype(compute_dtype)
    wh = jnp.concatenate([wmu, wlv], axis=1)
    bh = jnp.concatenate([bmu, blv], axis=1)
    return (w1.astype(cdt), b1.astype(jnp.float32),
            w2.astype(cdt), b2.astype(jnp.float32),
            wh.astype(cdt), bh.astype(jnp.float32))


# -----------------------------------------------------------------------------
# Wrapper
# -----------------------------------------------------------------------------
def encoder_forward(x, fused_params, *, tb=None):
    """x: (B, input_dim) f32.  Returns (mu, logvar), each (B, latent_dim) f32."""
    w1, b1, w2, b2, wh, bh = fused_params
    B, input_dim = x.shape
    hw = wh.shape[1]              # = 2 * latent_dim (unpadded output width)
    latent_dim = hw // 2

    # Batch tile selection:
    #   * cap 4096 (multiple of 8) — tiny feature dims, so even double-buffered
    #     this is ~1.5 MiB of VMEM, far under the scoped limit everywhere.
    #   * when B >= 16, force >=2 balanced grid steps so v7x megacore sharding
    #     ("parallel" batch axis) can use both TensorCores.
    if tb is None:
        cap = 4096
        if B >= 16:
            tb = min(cap, _round_up(pl.cdiv(B, 2), 8))
        else:
            tb = B
    grid = (pl.cdiv(B, tb),)

    batched = lambda feat: pl.BlockSpec((tb, feat), lambda i: (i, 0))
    resident = lambda arr: pl.BlockSpec(arr.shape, lambda i: (0, 0))

    # Advisory cost hint for XLA's scheduler.
    weight_bytes = sum(int(a.size) * a.dtype.itemsize
                       for a in (w1, b1, w2, b2, wh, bh))
    flops = 2 * B * (input_dim * w1.shape[1] + w1.shape[1] * w2.shape[1]
                     + w2.shape[1] * hw)
    bytes_accessed = (B * input_dim * x.dtype.itemsize
                      + B * hw * 4
                      + weight_bytes)

    fused = pl.pallas_call(
        _encoder_kernel,
        out_shape=jax.ShapeDtypeStruct((B, hw), jnp.float32),
        grid=grid,
        in_specs=[
            batched(input_dim),          # x: tiled along batch
            resident(w1), resident(b1),  # weights/biases VMEM-resident across steps
            resident(w2), resident(b2),
            resident(wh), resident(bh),
        ],
        out_specs=batched(hw),
        compiler_params=pltpu.CompilerParams(
            dimension_semantics=("parallel",)),
        cost_estimate=pl.CostEstimate(flops=int(flops),
                                      transcendentals=0,
                                      bytes_accessed=int(bytes_accessed)),
    )(x, w1, b1, w2, b2, wh, bh)

    # Free wrapper-side slices: split the fused slab back into mu / logvar.
    mu = fused[:, :latent_dim]
    logvar = fused[:, latent_dim:]
    return mu, logvar


# -----------------------------------------------------------------------------
# Init / reference
# -----------------------------------------------------------------------------
def init_linear(key, in_features, out_features):
    """PyTorch nn.Linear default init: U(-1/sqrt(fan_in), 1/sqrt(fan_in)).
    Weight stored as (in, out) = PyTorch weight transposed; bias as (1, out)."""
    kw, kb = jax.random.split(key)
    bound = 1.0 / jnp.sqrt(jnp.float32(in_features))
    w = jax.random.uniform(kw, (in_features, out_features), jnp.float32, -bound, bound)
    b = jax.random.uniform(kb, (1, out_features), jnp.float32, -bound, bound)
    return w, b


def init_encoder_params(key, input_dim, latent_dim):
    k1, k2, k3, k4 = jax.random.split(key, 4)
    return (
        init_linear(k1, input_dim, 64),      # fc[0]
        init_linear(k2, 64, 32),             # fc[2]
        init_linear(k3, 32, latent_dim),     # fc_mu
        init_linear(k4, 32, latent_dim),     # fc_logvar
    )


def encoder_reference(x, params):
    (w1, b1), (w2, b2), (wmu, bmu), (wlv, blv) = params
    h = jnp.maximum(x @ w1 + b1, 0.0)
    h = jnp.maximum(h @ w2 + b2, 0.0)
    return h @ wmu + bmu, h @ wlv + blv


# -----------------------------------------------------------------------------
# Main
# -----------------------------------------------------------------------------
if __name__ == "__main__":
    B, input_dim, latent_dim = 8, 32, 8

    key = jax.random.PRNGKey(0)
    kx, kp = jax.random.split(key)
    x = jax.random.normal(kx, (B, input_dim), jnp.float32)
    params = init_encoder_params(kp, input_dim, latent_dim)

    # Exact-f32 path (default; matches PyTorch f32 forward semantics).
    fused_f32 = fuse_encoder_params(params)
    mu, logvar = encoder_forward(x, fused_f32)
    jax.block_until_ready((mu, logvar))

    mu_ref, logvar_ref = encoder_reference(x, params)
    assert mu.shape == (B, latent_dim) and logvar.shape == (B, latent_dim)
    assert jnp.allclose(mu, mu_ref, atol=1e-5, rtol=1e-5)
    assert jnp.allclose(logvar, logvar_ref, atol=1e-5, rtol=1e-5)

    # Larger, non-tile-divisible batch: exercises the multi-step grid
    # (>=2 balanced steps -> both v7x TensorCores) and partial last tile.
    B2 = 1030
    x2 = jax.random.normal(jax.random.PRNGKey(1), (B2, input_dim), jnp.float32)
    mu2, lv2 = encoder_forward(x2, fused_f32)
    jax.block_until_ready((mu2, lv2))
    mu2_ref, lv2_ref = encoder_reference(x2, params)
    assert mu2.shape == (B2, latent_dim) and lv2.shape == (B2, latent_dim)
    assert jnp.allclose(mu2, mu2_ref, atol=1e-5, rtol=1e-5)
    assert jnp.allclose(lv2, lv2_ref, atol=1e-5, rtol=1e-5)

    # Optional bf16-operand fast path (numerics-accepted change per review):
    # bf16 operands, f32 accumulation; tolerance loosened accordingly.
    fused_bf16 = fuse_encoder_params(params, compute_dtype=jnp.bfloat16)
    mu3, lv3 = encoder_forward(x2, fused_bf16)
    jax.block_until_ready((mu3, lv3))
    assert jnp.allclose(mu3, mu2_ref, atol=5e-2, rtol=5e-2)
    assert jnp.allclose(lv3, lv2_ref, atol=5e-2, rtol=5e-2)

    print("KERNEL_OK")
</pallas_src>

<mosaic_0001>
module attributes {stable_mosaic.version = 11 : i64} {
  func.func @_encoder_kernel(%arg0: i32, %arg1: memref<8x32xf32, #tpu.memory_space<vmem>>, %arg2: memref<32x64xf32, #tpu.memory_space<vmem>>, %arg3: memref<1x64xf32, #tpu.memory_space<vmem>>, %arg4: memref<64x32xf32, #tpu.memory_space<vmem>>, %arg5: memref<1x32xf32, #tpu.memory_space<vmem>>, %arg6: memref<32x16xf32, #tpu.memory_space<vmem>>, %arg7: memref<1x16xf32, #tpu.memory_space<vmem>>, %arg8: memref<8x16xf32, #tpu.memory_space<vmem>>) attributes {dimension_semantics = [#tpu.dimension_semantics<parallel>], iteration_bounds = array<i64: 1>, scalar_prefetch = 0 : i64, scratch_operands = 0 : i64, tpu.core_type = #tpu.core_type<tc>, window_params = [{transform_indices = @transform_0, window_bounds = array<i64: 8, 32>}, {pipeline_mode = #tpu.pipeline_mode<synchronous>, transform_indices = @transform_1, window_bounds = array<i64: 32, 64>}, {pipeline_mode = #tpu.pipeline_mode<synchronous>, transform_indices = @transform_2, window_bounds = array<i64: 1, 64>}, {pipeline_mode = #tpu.pipeline_mode<synchronous>, transform_indices = @transform_3, window_bounds = array<i64: 64, 32>}, {pipeline_mode = #tpu.pipeline_mode<synchronous>, transform_indices = @transform_4, window_bounds = array<i64: 1, 32>}, {pipeline_mode = #tpu.pipeline_mode<synchronous>, transform_indices = @transform_5, window_bounds = array<i64: 32, 16>}, {pipeline_mode = #tpu.pipeline_mode<synchronous>, transform_indices = @transform_6, window_bounds = array<i64: 1, 16>}, {transform_indices = @transform_7, window_bounds = array<i64: 8, 16>}]} {
    %c0 = arith.constant 0 : index
    %c0_0 = arith.constant 0 : index
    %0 = vector.load %arg1[%c0, %c0_0] : memref<8x32xf32, #tpu.memory_space<vmem>>, vector<8x32xf32>
    %c0_1 = arith.constant 0 : index
    %c0_2 = arith.constant 0 : index
    %1 = vector.load %arg2[%c0_1, %c0_2] : memref<32x64xf32, #tpu.memory_space<vmem>>, vector<32x64xf32>
    %cst = arith.constant dense<0.000000e+00> : vector<8x64xf32>
    %2 = tpu.matmul %0, %1, %cst {dimension_numbers = #tpu.dot_dimension_numbers<[1], [0], [0], [1], [0, 0, 1, 1], [], []>} : vector<8x32xf32>, vector<32x64xf32>, vector<8x64xf32> -> vector<8x64xf32>
    %c0_3 = arith.constant 0 : index
    %c0_4 = arith.constant 0 : index
    %3 = vector.load %arg3[%c0_3, %c0_4] : memref<1x64xf32, #tpu.memory_space<vmem>>, vector<1x64xf32>
    %4 = vector.broadcast %3 : vector<1x64xf32> to vector<8x64xf32>
    %5 = arith.addf %2, %4 : vector<8x64xf32>
    %cst_5 = arith.constant 0.000000e+00 : f32
    %6 = vector.broadcast %cst_5 : f32 to vector<8x64xf32>
    %7 = arith.maximumf %5, %6 : vector<8x64xf32>
    %c0_6 = arith.constant 0 : index
    %c0_7 = arith.constant 0 : index
    %8 = vector.load %arg4[%c0_6, %c0_7] : memref<64x32xf32, #tpu.memory_space<vmem>>, vector<64x32xf32>
    %cst_8 = arith.constant dense<0.000000e+00> : vector<8x32xf32>
    %9 = tpu.matmul %7, %8, %cst_8 {dimension_numbers = #tpu.dot_dimension_numbers<[1], [0], [0], [1], [0, 0, 1, 1], [], []>} : vector<8x64xf32>, vector<64x32xf32>, vector<8x32xf32> -> vector<8x32xf32>
    %c0_9 = arith.constant 0 : index
    %c0_10 = arith.constant 0 : index
    %10 = vector.load %arg5[%c0_9, %c0_10] : memref<1x32xf32, #tpu.memory_space<vmem>>, vector<1x32xf32>
    %11 = vector.broadcast %10 : vector<1x32xf32> to vector<8x32xf32>
    %12 = arith.addf %9, %11 : vector<8x32xf32>
    %cst_11 = arith.constant 0.000000e+00 : f32
    %13 = vector.broadcast %cst_11 : f32 to vector<8x32xf32>
    %14 = arith.maximumf %12, %13 : vector<8x32xf32>
    %c0_12 = arith.constant 0 : index
    %c0_13 = arith.constant 0 : index
    %15 = vector.load %arg6[%c0_12, %c0_13] : memref<32x16xf32, #tpu.memory_space<vmem>>, vector<32x16xf32>
    %cst_14 = arith.constant dense<0.000000e+00> : vector<8x16xf32>
    %16 = tpu.matmul %14, %15, %cst_14 {dimension_numbers = #tpu.dot_dimension_numbers<[1], [0], [0], [1], [0, 0, 1, 1], [], []>} : vector<8x32xf32>, vector<32x16xf32>, vector<8x16xf32> -> vector<8x16xf32>
    %c0_15 = arith.constant 0 : index
    %c0_16 = arith.constant 0 : index
    %17 = vector.load %arg7[%c0_15, %c0_16] : memref<1x16xf32, #tpu.memory_space<vmem>>, vector<1x16xf32>
    %18 = vector.broadcast %17 : vector<1x16xf32> to vector<8x16xf32>
    %19 = arith.addf %16, %18 : vector<8x16xf32>
    %c0_17 = arith.constant 0 : index
    %c0_18 = arith.constant 0 : index
    %20 = vector.load %arg8[%c0_17, %c0_18] : memref<8x16xf32, #tpu.memory_space<vmem>>, vector<8x16xf32>
    tpu.vector_store %arg8[%c0_17, %c0_18], %19 {strides = array<i32>} : memref<8x16xf32, #tpu.memory_space<vmem>>, vector<8x16xf32>,
    return
  }
  func.func @transform_0(%arg0: i32) -> (i32, i32) {
    %c0_i32 = arith.constant 0 : i32
    %c0_i32_0 = arith.constant 0 : i32
    return %arg0, %c0_i32 : i32, i32
  }
  func.func @transform_1(%arg0: i32) -> (i32, i32) {
    %c0_i32 = arith.constant 0 : i32
    %c0_i32_0 = arith.constant 0 : i32
    %c0_i32_1 = arith.constant 0 : i32
    return %c0_i32, %c0_i32_0 : i32, i32
  }
  func.func @transform_2(%arg0: i32) -> (i32, i32) {
    %c0_i32 = arith.constant 0 : i32
    %c0_i32_0 = arith.constant 0 : i32
    %c0_i32_1 = arith.constant 0 : i32
    return %c0_i32, %c0_i32_0 : i32, i32
  }
  func.func @transform_3(%arg0: i32) -> (i32, i32) {
    %c0_i32 = arith.constant 0 : i32
    %c0_i32_0 = arith.constant 0 : i32
    %c0_i32_1 = arith.constant 0 : i32
    return %c0_i32, %c0_i32_0 : i32, i32
  }
  func.func @transform_4(%arg0: i32) -> (i32, i32) {
    %c0_i32 = arith.constant 0 : i32
    %c0_i32_0 = arith.constant 0 : i32
    %c0_i32_1 = arith.constant 0 : i32
    return %c0_i32, %c0_i32_0 : i32, i32
  }
  func.func @transform_5(%arg0: i32) -> (i32, i32) {
    %c0_i32 = arith.constant 0 : i32
    %c0_i32_0 = arith.constant 0 : i32
    %c0_i32_1 = arith.constant 0 : i32
    return %c0_i32, %c0_i32_0 : i32, i32
  }
  func.func @transform_6(%arg0: i32) -> (i32, i32) {
    %c0_i32 = arith.constant 0 : i32
    %c0_i32_0 = arith.constant 0 : i32
    %c0_i32_1 = arith.constant 0 : i32
    return %c0_i32, %c0_i32_0 : i32, i32
  }
  func.func @transform_7(%arg0: i32) -> (i32, i32) {
    %c0_i32 = arith.constant 0 : i32
    %c0_i32_0 = arith.constant 0 : i32
    return %arg0, %c0_i32 : i32, i32
  }
}

</mosaic_0001>

<bundles_post_ra>
// kernel: tpu_custom_call.1
= control target key start
LH: loop header
LB: loop body
LE: loop exit
PB: predicated region body
PF: predicated region fallthrough
CT: control target
= control target key end

     0   :  { %v422_v3 = vmov 0.0|0.0   ;;  %vm423_vm0 = vmmov 0   ;;  %v424_v6 = vmov 0.0   ;;  %s543_s0 = inlined_call_operand.vmem [shape: f32[8,32], index: 0, kind: input, shape index: {}]   ;;  %s544_s1 = inlined_call_operand.vmem [shape: f32[32,64], index: 1, kind: input, shape index: {}]   ;;  %s545_s2 = inlined_call_operand.vmem [shape: f32[1,64], index: 2, kind: input, shape index: {}]   ;;  %s546_s3 = inlined_call_operand.vmem [shape: f32[64,32], index: 3, kind: input, shape index: {}]   ;;  %s547_s4 = inlined_call_operand.vmem [shape: f32[1,32], index: 4, kind: input, shape index: {}]   ;;  %s548_s5 = inlined_call_operand.vmem [shape: f32[32,16], index: 5, kind: input, shape index: {}]   ;;  %s549_s6 = inlined_call_operand.vmem [shape: f32[1,16], index: 6, kind: input, shape index: {}]   ;;  %s550_s7 = inlined_call_operand.hbm [shape: f32[8,16], index: 7, kind: output, shape index: {}]  }
   0x1   :  { %v28_v0 = vld [vmem:[%s544_s1] sm:$0xff]  ;;  %v29_v1 = vld [vmem:[%s544_s1 + $0x8] sm:$0xff]  ;;  %v30_v2 = vld [vmem:[%s544_s1 + $0x10] sm:$0xff]  ;;  %370 = vmatprep.subr.bf16.mxu0 %v422_v3  ;;  %337 = vmatprep.mubr.msk.f32.mxu0 %vm423_vm0, %v424_v6 }
   0x2   :  { %v371_v4 = vpack.c.bf16 %v29_v1, %v28_v0  ;;  %v31_v5 = vld [vmem:[%s544_s1 + $0x18] sm:$0xff]  ;;  %v114_v7 = vld [vmem:[%s546_s3] sm:$0xff]  ;;  %376 = vmatprep.subr.bf16.mxu1 %v422_v3  ;;  %v115_v8 = vld [vmem:[%s546_s3 + $0x8] sm:$0xff]  ;;  %356 = vmatprep.mubr.msk.f32.mxu1 %vm423_vm0, %v424_v6 }
   0x3   :  { %v116_v9 = vld [vmem:[%s546_s3 + $0x10] sm:$0xff]  ;;  %v117_v10 = vld [vmem:[%s546_s3 + $0x18] sm:$0xff]  ;;  %v374_v11 = vpack.c.bf16 %v31_v5, %v30_v2  ;;  %v377_v12 = vpack.c.bf16 %v115_v8, %v114_v7 }
   0x4   :  { %372 = vmatpush3.bf16.msra.mxu0 %v371_v4 }
   0x5   :  { %373 = vmatprep.subr.bf16.mxu0 %v422_v3 }
   0x6   :  { %12 = vsyncpa [#allocation3], 0  ;;  %378 = vmatpush3.bf16.msra.mxu1 %v377_v12  ;;  %v380_v13 = vpack.c.bf16 %v117_v10, %v116_v9  ;;  %v118_v14 = vld [vmem:[%s546_s3 + $0x20] sm:$0xff]  ;;  %v119_v15 = vld [vmem:[%s546_s3 + $0x28] sm:$0xff]  ;;  %vm39_vm1 = vcmask 261120   ;;  %vm129_vm2 = vcmask 523264  }
   0x7   :  { %379 = vmatprep.subr.bf16.mxu1 %v422_v3  ;;  %v27_v16 = vld [vmem:[%s543_s0] sm:$0xff]  ;;  %v383_v17 = vpack.c.bf16 %v119_v15, %v118_v14  ;;  %v120_v18 = vld [vmem:[%s546_s3 + $0x30] sm:$0xff]  ;;  %v121_v19 = vld [vmem:[%s546_s3 + $0x38] sm:$0xff]  ;;  %s425_s14 = smov [#allocation2]   ;;  %vm288_vm3 = vcmask 130048  }
   0x8   :  { %375 = vmatpush3.bf16.msra.mxu0 %v374_v11  ;;  %v386_v20 = vpack.c.bf16 %v121_v19, %v120_v18  ;;  %v204_v21 = vld [vmem:[%s548_s5] sm:$0xff]  ;;  %v205_v22 = vld [vmem:[%s548_s5 + $0x8] sm:$0xff]  ;;  %v206_v29 = vld [vmem:[%s548_s5 + $0x10] sm:$0xff]  ;;  %s296_s15 = sshll.u32 %s425_s14, 4  ;;  %s297_s15 = int_to_ptr.vmem [resolvable:$true] %s296_s15 }
   0x9   :  { %388 = vmatprep.subr.bf16.mxu0 %v422_v3  ;;  %v389_v23 = vpack.c.bf16 %v205_v22, %v204_v21  ;;  %v304_v24 = vld [vmem:[%s545_s2] ss:$0 sm:$0xff]  ;;  %v207_v30 = vld [vmem:[%s548_s5 + $0x18] sm:$0xff]  ;;  %s398_s5 = scalar_lea.vmem %s297_s15, 128  ;;  %p403_p1 = scmp.lt.s32.totalorder %s297_s15, %s297_s15 }
   0xa   :  { %381 = vmatpush3.bf16.msra.mxu1 %v380_v13  ;;  %v392_v31 = vpack.c.bf16 %v207_v30, %v206_v29  ;;  %v306_v32 = vld [vmem:[%s547_s4] ss:$0 sm:$0xff]  ;;  %p399_p0 = scmp.ne.s32.totalorder %s297_s15, %s398_s5  ;;  %p404_p2 = scmp.lt.s32.totalorder %s398_s5, %s398_s5 }
   0xb   :  { %338 = vmatmul.mubr.msk.f32.vlgmr.msra.gmra.mrb[0].mxu0 %vm39_vm1, %v27_v16  ;;  %382 = vmatprep.subr.bf16.mxu1 %v422_v3  ;;  %v308_v37 = vld [vmem:[%s549_s6] ss:$0 sm:$0xff] }
   0xc   :  { %367 = vmatprep.mubr.msk.f32.mxu0 %vm423_vm0, %v424_v6  ;;  %390 = vmatpush3.bf16.msra.mxu0 %v389_v23  ;;  %p405_p3 = por %p404_p2, %p403_p1 }
   0xd   :  { %391 = vmatprep.subr.bf16.mxu0 %v422_v3 }
   0xe   :  { %384 = vmatpush3.bf16.msra.mxu1 %v383_v17  ;;  %p406_p4 = pnand %p405_p3, %p399_p0 }
   0xf   :  { %385 = vmatprep.subr.bf16.mxu1 %v422_v3 }
  0x10   :  { %393 = vmatpush3.bf16.msra.mxu0 %v392_v31 }
  0x12   :  { %387 = vmatpush3.bf16.msra.mxu1 %v386_v20 }
  0xde   :  { %v109_v25 = vpop.f32.mrb[0].mxu0 }
  0xdf   :  { %v110_v26 = vadd.f32 %v304_v24, %v109_v25  ;;  %v339_v27 = vpop.f32.mrb[1].mxu0 }
  0xe1   :  { %v113_v28 = vmax.f32 %v110_v26, 0.0 }
  0xe3   :  { %357 = vmatmul.mubr.msk.f32.vlgmr.msra.gmra.mrb[0].mxu1 %vm129_vm2, %v113_v28 }
 0x1b6   :  { %v199_v33 = vpop.f32.mrb[0].mxu1 }
 0x1b7   :  { %v200_v34 = vadd.f32 %v306_v32, %v199_v33  ;;  %v358_v35 = vpop.f32.mrb[1].mxu1 }
 0x1b9   :  { %v203_v36 = vmax.f32 %v200_v34, 0.0 }
 0x1bb   :  { %368 = vmatmul.mubr.msk.f32.vlgmr.msra.gmra.mrb[2].mxu0 %vm39_vm1, %v203_v36 }
 0x28e   :  { %v284_v38 = vpop.f32.mrb[2].mxu0 }
 0x28f   :  { %v285_v39 = vadd.f32 %v308_v37, %v284_v38  ;;  %v369_v40 = vpop.f32.mrb[3].mxu0 }
 0x291   :  { %289 = vst.msk [vmem:[#allocation2] sm:$0xff] %vm288_vm3, %v285_v39 }
 0x292   :  { %409 = shalt.err (!%p406_p4)
}
 0x293   :  { %s410_s1 = scalar_lea.hbm %s550_s7, 128 }
 0x294   :  { %p411_p5 = scmp.ne.s32.totalorder %s550_s7, %s410_s1  ;;  %p414_p6 = scmp.lt.u32.totalorder %s410_s1, %s550_s7 }
 0x296   :  { %p416_p7 = pnand %p414_p6, %p411_p5 }
 0x298   :  { %419 = shalt.err (!%p416_p7)
}
 0x299   :  { %299 = dma.vmem_to_hbm [thread:$0]  %s297_s15, 128, %s550_s7, [#allocation3]  }
 0x29a   :  { %420 = dma.done.wait [#allocation3], 128  }
 0x29b   :  { %421 = vsyncadd [#allocation3], 4294967168 }
 0x29c   :  { %303 = vsyncpa [#allocation3], 1 }

</bundles_post_ra>
